<compile_context>
chip_gen: v5e
topology: v5e:2x2
jax: 0.10.0
libtpu: 0.0.40
codegen_flags: <defaults>
</compile_context>

<pallas_src>
import functools

import jax
import jax.numpy as jnp
from jax import lax
from jax.experimental import pallas as pl
from jax.experimental.pallas import tpu as pltpu


def _round_up(x, m):
    return (x + m - 1) // m * m


def _vmem_limit_bytes():
    cap = 64 * 1024 * 1024                     # conservative fallback (v7x-sized)
    try:
        info = pltpu.get_tpu_info()
        cap = int(getattr(info, "vmem_capacity_bytes", cap)) or cap
    except Exception:
        pass
    return int(min(cap * 3 // 4, 96 * 1024 * 1024))


# ----------------------------------------------------------------------------
# Kernel A: per-pixel -log softmax[target] and mask_prob = exp(-nll) (1.0 for
# ignored pixels).  Block views: pred (C, TS, 128), target (TS, 128).
# Class axis is the leading (slab) axis: pass 1 is a running max, pass 2 fuses
# the exp-sum with the one-hot gather of the target logit (no iota slab).
# ----------------------------------------------------------------------------
def _nll_kernel(pred_ref, tgt_ref, nll_ref, prob_ref, *, ignore_index, num_classes):
    t = tgt_ref[...]                                    # (TS, 128) int32
    valid = t != ignore_index
    tc = jnp.where(valid, t, 0)                         # clamp ignored -> class 0

    # pass 1: running max over class slabs (one vload per class)
    m = pred_ref[0].astype(jnp.float32)
    for ci in range(1, num_classes):
        m = jnp.maximum(m, pred_ref[ci].astype(jnp.float32))

    # pass 2 (fused): exp-sum + gather of the target-class logit
    s = jnp.zeros_like(m)
    logit_t = jnp.zeros_like(m)
    for ci in range(num_classes):
        x_c = pred_ref[ci].astype(jnp.float32)
        s = s + jnp.exp(x_c - m)
        logit_t = logit_t + jnp.where(tc == ci, x_c, 0.0)

    nll = (m + jnp.log(s)) - logit_t                    # -log softmax[target]
    nll_ref[...] = nll
    prob_ref[...] = jnp.where(valid, jnp.exp(-nll), 1.0)


# ----------------------------------------------------------------------------
# Kernel B: fused OHEM masking + (weighted) sum reductions.
# Inputs: scalar threshold (SMEM), optional class-weight table (SMEM),
#         nll (TS_B, 128), target (TS_B, 128).
# Outputs (1,1) scalars: [sum nll*w_keep, sum w_keep, sum nll*w_valid,
#                          sum w_valid, num_valid].
# Elementwise accumulation into (TS_B,128) VMEM scratch; one cross-lane reduce
# per accumulator at the very end.
# ----------------------------------------------------------------------------
def _ohem_reduce_kernel(*refs, ignore_index, num_classes, has_cw):
    idx = 0
    thr_ref = refs[idx]; idx += 1
    if has_cw:
        cw_ref = refs[idx]; idx += 1
    nll_ref = refs[idx]
    tgt_ref = refs[idx + 1]; idx += 2
    lk_ref, ck_ref, lv_ref, cv_ref, nv_ref = refs[idx:idx + 5]; idx += 5
    accs = refs[idx:idx + 5]
    acc_lk, acc_ck, acc_lv, acc_cv, acc_nv = accs

    @pl.when(pl.program_id(0) == 0)
    def _():
        for a in accs:
            a[...] = jnp.zeros_like(a)

    thr = thr_ref[0]                                    # scalar from SMEM
    nll = nll_ref[...]
    t = tgt_ref[...]
    valid = (t != ignore_index).astype(jnp.float32)
    kept = (jnp.exp(-nll) <= thr).astype(jnp.float32)   # EUP exp rides DMA slack

    w_valid = valid
    if has_cw:
        cw = jnp.zeros_like(nll)
        for ci in range(num_classes):                   # tiny one-hot gather of cw
            cw = cw + jnp.where(t == ci, cw_ref[ci], 0.0)
        w_valid = w_valid * cw

    lv_term = nll * w_valid
    acc_lv[...] += lv_term
    acc_cv[...] += w_valid
    acc_lk[...] += lv_term * kept
    acc_ck[...] += w_valid * kept
    acc_nv[...] += valid

    @pl.when(pl.program_id(0) == pl.num_programs(0) - 1)
    def _():
        lk_ref[...] = jnp.sum(acc_lk[...], keepdims=True)
        ck_ref[...] = jnp.sum(acc_ck[...], keepdims=True)
        lv_ref[...] = jnp.sum(acc_lv[...], keepdims=True)
        cv_ref[...] = jnp.sum(acc_cv[...], keepdims=True)
        nv_ref[...] = jnp.sum(acc_nv[...], keepdims=True)


# ----------------------------------------------------------------------------
# Wrapper reproducing OhemCrossEntropy2dTensor.forward
# ----------------------------------------------------------------------------
def ohem_cross_entropy_2d(pred, target, *, ignore_index=255, thresh=0.7,
                          min_kept=10000, class_weight=None,
                          tile_rows=512, reduce_tile_rows=2048):
    b, c, h, w = pred.shape
    hw = h * w
    n = b * hw
    esize = jnp.dtype(pred.dtype).itemsize
    vmem_limit = _vmem_limit_bytes()

    # ---- kernel A tile: TS_A sublane rows of 128 pixels, VMEM-budgeted ----
    per_row_a = 128 * (c * esize + 4 + 4 + 4)       # pred + tgt + nll + prob / pixel-row
    budget_a = vmem_limit // 2                       # double-buffered blocks <= half
    max_rows_a = max(8, (budget_a // (2 * per_row_a)) // 8 * 8)
    rows = -(-hw // 128)
    ts_a = int(min(tile_rows, max_rows_a, _round_up(rows, 8)))
    ts_a = max(8, (ts_a // 8) * 8)
    rows_p = _round_up(rows, ts_a)
    hw_p = rows_p * 128

    # Free reshapes (no class-axis transpose); pad pixel axis only if needed.
    logits = pred.reshape(b, c, hw)
    tgt = target.reshape(b, hw).astype(jnp.int32)
    if hw_p != hw:
        logits = jnp.pad(logits, ((0, 0), (0, 0), (0, hw_p - hw)))
        tgt = jnp.pad(tgt, ((0, 0), (0, hw_p - hw)), constant_values=ignore_index)
    logits = logits.reshape(b, c, rows_p, 128)
    tgt = tgt.reshape(b, rows_p, 128)

    kern_a = functools.partial(_nll_kernel, ignore_index=ignore_index, num_classes=c)
    nll, prob = pl.pallas_call(
        kern_a,
        out_shape=(jax.ShapeDtypeStruct((b, rows_p, 128), jnp.float32),
                   jax.ShapeDtypeStruct((b, rows_p, 128), jnp.float32)),
        grid_spec=pltpu.PrefetchScalarGridSpec(
            num_scalar_prefetch=0,
            grid=(b, rows_p // ts_a),
            in_specs=[pl.BlockSpec((None, c, ts_a, 128), lambda bi, ti: (bi, 0, ti, 0)),
                      pl.BlockSpec((None, ts_a, 128), lambda bi, ti: (bi, ti, 0))],
            out_specs=(pl.BlockSpec((None, ts_a, 128), lambda bi, ti: (bi, ti, 0)),
                       pl.BlockSpec((None, ts_a, 128), lambda bi, ti: (bi, ti, 0)))),
        compiler_params=pltpu.CompilerParams(
            dimension_semantics=("parallel", "parallel"),
            vmem_limit_bytes=vmem_limit),
    )(logits, tgt)

    # ---- OHEM threshold: single scalar ----
    # TODO(synk): the data-dependent `print('Labels: ...')` side effect of the
    # PyTorch module is omitted (no clean traced equivalent).
    if min_kept > 0:
        k = int(min(n, min_kept))
        prob_flat = prob.reshape(-1)     # padded/invalid pixels hold 1.0 -> kth unchanged
        # Exact kth-smallest via top_k of negated probs (cheaper than full sort).
        # For very large n this could become a streaming histogram + refine
        # kth-value search; kept exact here to preserve module semantics.
        kth = -lax.top_k(-prob_flat, k)[0][k - 1]
        threshold = jnp.maximum(kth, jnp.float32(thresh))
    else:
        threshold = jnp.float32(thresh)

    # ---- kernel B tile: decoupled from kernel A, large, exact divisor ----
    total_rows = b * rows_p
    blocks_a = total_rows // ts_a
    per_row_b = 128 * ((4 + 4) * 2 + 5 * 4)          # dbuf'd nll+tgt blocks + 5 f32 accs
    max_rows_b = max(8, ((vmem_limit // 2) // per_row_b) // 8 * 8)
    m_desired = max(1, int(min(reduce_tile_rows, max_rows_b)) // ts_a)
    g = 1
    for cand in range(min(m_desired, blocks_a), 0, -1):
        if blocks_a % cand == 0:
            g = cand
            break
    ts_b = g * ts_a
    grid_b = blocks_a // g

    has_cw = class_weight is not None
    kern_b = functools.partial(_ohem_reduce_kernel, ignore_index=ignore_index,
                               num_classes=c, has_cw=has_cw)
    in_specs = [pl.BlockSpec(memory_space=pltpu.MemorySpace.SMEM)]
    operands = [jnp.asarray(threshold, dtype=jnp.float32).reshape(1)]
    if has_cw:
        in_specs.append(pl.BlockSpec(memory_space=pltpu.MemorySpace.SMEM))
        operands.append(jnp.asarray(class_weight, dtype=jnp.float32).reshape(c))
    in_specs += [pl.BlockSpec((ts_b, 128), lambda i: (i, 0)),
                 pl.BlockSpec((ts_b, 128), lambda i: (i, 0))]
    operands += [nll.reshape(total_rows, 128), tgt.reshape(total_rows, 128)]

    scalar_out = jax.ShapeDtypeStruct((1, 1), jnp.float32)
    scalar_spec = pl.BlockSpec((1, 1), lambda i: (0, 0))
    outs = pl.pallas_call(
        kern_b,
        out_shape=(scalar_out,) * 5,
        grid_spec=pltpu.PrefetchScalarGridSpec(
            num_scalar_prefetch=0,
            grid=(grid_b,),
            in_specs=in_specs,
            out_specs=(scalar_spec,) * 5,
            scratch_shapes=[pltpu.VMEM((ts_b, 128), jnp.float32)] * 5),
        # NOTE(v7x): single-core sequential reduction is acceptable once blocks
        # are large (kernel is HBM-bound and tiny relative to kernel A).
        compiler_params=pltpu.CompilerParams(
            dimension_semantics=("arbitrary",),
            vmem_limit_bytes=vmem_limit),
    )(*operands)

    loss_k, cnt_k, loss_v, cnt_v, n_valid = [o[0, 0] for o in outs]

    if min_kept > 0:
        # Module applies OHEM iff num_valid >= min_kept and num_valid > 0.
        apply_ohem = (n_valid >= jnp.float32(min_kept)) & (n_valid > 0)
        loss = jnp.where(apply_ohem, loss_k / cnt_k, loss_v / cnt_v)
    else:
        loss = loss_v / cnt_v
    # NOTE: all pixels ignored -> 0/0 = NaN, matching torch CrossEntropyLoss.
    return loss


# ----------------------------------------------------------------------------
# Pure-JAX reference (mirrors the PyTorch module) for a correctness check.
# ----------------------------------------------------------------------------
def ref_ohem_ce(pred, target, *, ignore_index=255, thresh=0.7, min_kept=10000):
    b, c, h, w = pred.shape
    n = b * h * w
    t = target.reshape(-1).astype(jnp.int32)
    valid = t != ignore_index
    tc = jnp.where(valid, t, 0)
    logits = jnp.transpose(pred, (1, 0, 2, 3)).reshape(c, n).astype(jnp.float32)
    lse = jax.scipy.special.logsumexp(logits, axis=0)
    logit_t = logits[tc, jnp.arange(n)]
    nll = lse - logit_t
    mask_prob = jnp.where(valid, jnp.exp(-nll), 1.0)
    num_valid = jnp.sum(valid)
    if min_kept > 0:
        k = min(n, min_kept)
        kth = jnp.sort(mask_prob)[k - 1]
        threshold = jnp.where(kth > thresh, kth, thresh)
        kept = mask_prob <= threshold
        apply_ohem = (num_valid >= min_kept) & (num_valid > 0)
        final_valid = jnp.where(apply_ohem, valid & kept, valid)
    else:
        final_valid = valid
    fv = final_valid.astype(jnp.float32)
    return jnp.sum(nll * fv) / jnp.sum(fv)


if __name__ == "__main__":
    # Small, module-consistent shapes: pred NCHW = (2, 4, 16, 16), target (2,16,16)
    b, c, h, w = 2, 4, 16, 16
    ignore_index, thresh, min_kept = 255, 0.7, 100  # use_weight=False (default)

    key = jax.random.PRNGKey(0)
    k1, k2, k3 = jax.random.split(key, 3)
    pred = jax.random.normal(k1, (b, c, h, w), dtype=jnp.float32) * 2.0
    target = jax.random.randint(k2, (b, h, w), 0, c, dtype=jnp.int32)
    ignore_mask = jax.random.uniform(k3, (b, h, w)) < 0.2
    target = jnp.where(ignore_mask, ignore_index, target)

    loss = ohem_cross_entropy_2d(pred, target, ignore_index=ignore_index,
                                 thresh=thresh, min_kept=min_kept)
    loss = jax.block_until_ready(loss)

    ref = ref_ohem_ce(pred, target, ignore_index=ignore_index,
                      thresh=thresh, min_kept=min_kept)
    assert jnp.isfinite(loss), "loss is not finite"
    assert jnp.allclose(loss, ref, atol=1e-4, rtol=1e-4), (loss, ref)
    print("KERNEL_OK")
</pallas_src>

<mosaic_0001>
module attributes {stable_mosaic.version = 11 : i64} {
  func.func @_nll_kernel(%arg0: i32, %arg1: i32, %arg2: memref<1x4x8x128xf32, #tpu.memory_space<vmem>>, %arg3: memref<1x8x128xi32, #tpu.memory_space<vmem>>, %arg4: memref<1x8x128xf32, #tpu.memory_space<vmem>>, %arg5: memref<1x8x128xf32, #tpu.memory_space<vmem>>) attributes {dimension_semantics = [#tpu.dimension_semantics<parallel>, #tpu.dimension_semantics<parallel>], iteration_bounds = array<i64: 2, 1>, scalar_prefetch = 0 : i64, scratch_operands = 0 : i64, tpu.core_type = #tpu.core_type<tc>, window_params = [{transform_indices = @transform_0, window_bounds = array<i64: 1, 4, 8, 128>}, {transform_indices = @transform_1, window_bounds = array<i64: 1, 8, 128>}, {transform_indices = @transform_2, window_bounds = array<i64: 1, 8, 128>}, {transform_indices = @transform_3, window_bounds = array<i64: 1, 8, 128>}]} {
    %c0 = arith.constant 0 : index
    %c0_0 = arith.constant 0 : index
    %c0_1 = arith.constant 0 : index
    %0 = vector.load %arg3[%c0, %c0_0, %c0_1] : memref<1x8x128xi32, #tpu.memory_space<vmem>>, vector<1x8x128xi32>
    %1 = vector.shape_cast %0 : vector<1x8x128xi32> to vector<8x128xi32>
    %c255_i32 = arith.constant 255 : i32
    %2 = vector.broadcast %c255_i32 : i32 to vector<8x128xi32>
    %3 = arith.cmpi ne, %1, %2 : vector<8x128xi32>
    %c0_i32 = arith.constant 0 : i32
    %4 = vector.broadcast %c0_i32 : i32 to vector<8x128xi32>
    %5 = arith.select %3, %1, %4 : vector<8x128xi1>, vector<8x128xi32>
    %c0_2 = arith.constant 0 : index
    %c0_3 = arith.constant 0 : index
    %c0_4 = arith.constant 0 : index
    %c0_5 = arith.constant 0 : index
    %6 = vector.load %arg2[%c0_2, %c0_3, %c0_4, %c0_5] : memref<1x4x8x128xf32, #tpu.memory_space<vmem>>, vector<1x1x8x128xf32>
    %7 = vector.shape_cast %6 : vector<1x1x8x128xf32> to vector<8x128xf32>
    %c0_6 = arith.constant 0 : index
    %c1 = arith.constant 1 : index
    %c0_7 = arith.constant 0 : index
    %c0_8 = arith.constant 0 : index
    %8 = vector.load %arg2[%c0_6, %c1, %c0_7, %c0_8] : memref<1x4x8x128xf32, #tpu.memory_space<vmem>>, vector<1x1x8x128xf32>
    %9 = vector.shape_cast %8 : vector<1x1x8x128xf32> to vector<8x128xf32>
    %10 = arith.maximumf %7, %9 : vector<8x128xf32>
    %c0_9 = arith.constant 0 : index
    %c2 = arith.constant 2 : index
    %c0_10 = arith.constant 0 : index
    %c0_11 = arith.constant 0 : index
    %11 = vector.load %arg2[%c0_9, %c2, %c0_10, %c0_11] : memref<1x4x8x128xf32, #tpu.memory_space<vmem>>, vector<1x1x8x128xf32>
    %12 = vector.shape_cast %11 : vector<1x1x8x128xf32> to vector<8x128xf32>
    %13 = arith.maximumf %10, %12 : vector<8x128xf32>
    %c0_12 = arith.constant 0 : index
    %c3 = arith.constant 3 : index
    %c0_13 = arith.constant 0 : index
    %c0_14 = arith.constant 0 : index
    %14 = vector.load %arg2[%c0_12, %c3, %c0_13, %c0_14] : memref<1x4x8x128xf32, #tpu.memory_space<vmem>>, vector<1x1x8x128xf32>
    %15 = vector.shape_cast %14 : vector<1x1x8x128xf32> to vector<8x128xf32>
    %16 = arith.maximumf %13, %15 : vector<8x128xf32>
    %cst = arith.constant 0.000000e+00 : f32
    %17 = vector.broadcast %cst : f32 to vector<8x128xf32>
    %cst_15 = arith.constant 0.000000e+00 : f32
    %18 = vector.broadcast %cst_15 : f32 to vector<8x128xf32>
    %c0_16 = arith.constant 0 : index
    %c0_17 = arith.constant 0 : index
    %c0_18 = arith.constant 0 : index
    %c0_19 = arith.constant 0 : index
    %19 = vector.load %arg2[%c0_16, %c0_17, %c0_18, %c0_19] : memref<1x4x8x128xf32, #tpu.memory_space<vmem>>, vector<1x1x8x128xf32>
    %20 = vector.shape_cast %19 : vector<1x1x8x128xf32> to vector<8x128xf32>
    %21 = arith.subf %20, %16 : vector<8x128xf32>
    %22 = math.exp %21 : vector<8x128xf32>
    %23 = arith.addf %17, %22 : vector<8x128xf32>
    %c0_i32_20 = arith.constant 0 : i32
    %24 = vector.broadcast %c0_i32_20 : i32 to vector<8x128xi32>
    %25 = arith.cmpi eq, %5, %24 : vector<8x128xi32>
    %cst_21 = arith.constant 0.000000e+00 : f32
    %26 = vector.broadcast %cst_21 : f32 to vector<8x128xf32>
    %27 = arith.select %25, %20, %26 : vector<8x128xi1>, vector<8x128xf32>
    %28 = arith.addf %18, %27 : vector<8x128xf32>
    %c0_22 = arith.constant 0 : index
    %c1_23 = arith.constant 1 : index
    %c0_24 = arith.constant 0 : index
    %c0_25 = arith.constant 0 : index
    %29 = vector.load %arg2[%c0_22, %c1_23, %c0_24, %c0_25] : memref<1x4x8x128xf32, #tpu.memory_space<vmem>>, vector<1x1x8x128xf32>
    %30 = vector.shape_cast %29 : vector<1x1x8x128xf32> to vector<8x128xf32>
    %31 = arith.subf %30, %16 : vector<8x128xf32>
    %32 = math.exp %31 : vector<8x128xf32>
    %33 = arith.addf %23, %32 : vector<8x128xf32>
    %c1_i32 = arith.constant 1 : i32
    %34 = vector.broadcast %c1_i32 : i32 to vector<8x128xi32>
    %35 = arith.cmpi eq, %5, %34 : vector<8x128xi32>
    %cst_26 = arith.constant 0.000000e+00 : f32
    %36 = vector.broadcast %cst_26 : f32 to vector<8x128xf32>
    %37 = arith.select %35, %30, %36 : vector<8x128xi1>, vector<8x128xf32>
    %38 = arith.addf %28, %37 : vector<8x128xf32>
    %c0_27 = arith.constant 0 : index
    %c2_28 = arith.constant 2 : index
    %c0_29 = arith.constant 0 : index
    %c0_30 = arith.constant 0 : index
    %39 = vector.load %arg2[%c0_27, %c2_28, %c0_29, %c0_30] : memref<1x4x8x128xf32, #tpu.memory_space<vmem>>, vector<1x1x8x128xf32>
    %40 = vector.shape_cast %39 : vector<1x1x8x128xf32> to vector<8x128xf32>
    %41 = arith.subf %40, %16 : vector<8x128xf32>
    %42 = math.exp %41 : vector<8x128xf32>
    %43 = arith.addf %33, %42 : vector<8x128xf32>
    %c2_i32 = arith.constant 2 : i32
    %44 = vector.broadcast %c2_i32 : i32 to vector<8x128xi32>
    %45 = arith.cmpi eq, %5, %44 : vector<8x128xi32>
    %cst_31 = arith.constant 0.000000e+00 : f32
    %46 = vector.broadcast %cst_31 : f32 to vector<8x128xf32>
    %47 = arith.select %45, %40, %46 : vector<8x128xi1>, vector<8x128xf32>
    %48 = arith.addf %38, %47 : vector<8x128xf32>
    %c0_32 = arith.constant 0 : index
    %c3_33 = arith.constant 3 : index
    %c0_34 = arith.constant 0 : index
    %c0_35 = arith.constant 0 : index
    %49 = vector.load %arg2[%c0_32, %c3_33, %c0_34, %c0_35] : memref<1x4x8x128xf32, #tpu.memory_space<vmem>>, vector<1x1x8x128xf32>
    %50 = vector.shape_cast %49 : vector<1x1x8x128xf32> to vector<8x128xf32>
    %51 = arith.subf %50, %16 : vector<8x128xf32>
    %52 = math.exp %51 : vector<8x128xf32>
    %53 = arith.addf %43, %52 : vector<8x128xf32>
    %c3_i32 = arith.constant 3 : i32
    %54 = vector.broadcast %c3_i32 : i32 to vector<8x128xi32>
    %55 = arith.cmpi eq, %5, %54 : vector<8x128xi32>
    %cst_36 = arith.constant 0.000000e+00 : f32
    %56 = vector.broadcast %cst_36 : f32 to vector<8x128xf32>
    %57 = arith.select %55, %50, %56 : vector<8x128xi1>, vector<8x128xf32>
    %58 = arith.addf %48, %57 : vector<8x128xf32>
    %59 = math.log %53 : vector<8x128xf32>
    %60 = arith.addf %16, %59 : vector<8x128xf32>
    %61 = arith.subf %60, %58 : vector<8x128xf32>
    %c0_37 = arith.constant 0 : index
    %c0_38 = arith.constant 0 : index
    %c0_39 = arith.constant 0 : index
    %62 = vector.load %arg4[%c0_37, %c0_38, %c0_39] : memref<1x8x128xf32, #tpu.memory_space<vmem>>, vector<1x8x128xf32>
    %63 = vector.shape_cast %62 : vector<1x8x128xf32> to vector<8x128xf32>
    %64 = vector.shape_cast %61 : vector<8x128xf32> to vector<1x8x128xf32>
    tpu.vector_store %arg4[%c0_37, %c0_38, %c0_39], %64 {strides = array<i32>} : memref<1x8x128xf32, #tpu.memory_space<vmem>>, vector<1x8x128xf32>,
    %cst_40 = arith.constant 0.000000e+00 : f32
    %65 = vector.broadcast %cst_40 : f32 to vector<8x128xf32>
    %66 = arith.subf %65, %61 : vector<8x128xf32>
    %67 = math.exp %66 : vector<8x128xf32>
    %cst_41 = arith.constant 1.000000e+00 : f32
    %68 = vector.broadcast %cst_41 : f32 to vector<8x128xf32>
    %69 = arith.select %3, %67, %68 : vector<8x128xi1>, vector<8x128xf32>
    %c0_42 = arith.constant 0 : index
    %c0_43 = arith.constant 0 : index
    %c0_44 = arith.constant 0 : index
    %70 = vector.load %arg5[%c0_42, %c0_43, %c0_44] : memref<1x8x128xf32, #tpu.memory_space<vmem>>, vector<1x8x128xf32>
    %71 = vector.shape_cast %70 : vector<1x8x128xf32> to vector<8x128xf32>
    %72 = vector.shape_cast %69 : vector<8x128xf32> to vector<1x8x128xf32>
    tpu.vector_store %arg5[%c0_42, %c0_43, %c0_44], %72 {strides = array<i32>} : memref<1x8x128xf32, #tpu.memory_space<vmem>>, vector<1x8x128xf32>,
    return
  }
  func.func @transform_0(%arg0: i32, %arg1: i32) -> (i32, i32, i32, i32) {
    %c0_i32 = arith.constant 0 : i32
    %c0_i32_0 = arith.constant 0 : i32
    %c0_i32_1 = arith.constant 0 : i32
    return %arg0, %c0_i32, %arg1, %c0_i32_0 : i32, i32, i32, i32
  }
  func.func @transform_1(%arg0: i32, %arg1: i32) -> (i32, i32, i32) {
    %c0_i32 = arith.constant 0 : i32
    %c0_i32_0 = arith.constant 0 : i32
    return %arg0, %arg1, %c0_i32 : i32, i32, i32
  }
  func.func @transform_2(%arg0: i32, %arg1: i32) -> (i32, i32, i32) {
    %c0_i32 = arith.constant 0 : i32
    %c0_i32_0 = arith.constant 0 : i32
    return %arg0, %arg1, %c0_i32 : i32, i32, i32
  }
  func.func @transform_3(%arg0: i32, %arg1: i32) -> (i32, i32, i32) {
    %c0_i32 = arith.constant 0 : i32
    %c0_i32_0 = arith.constant 0 : i32
    return %arg0, %arg1, %c0_i32 : i32, i32, i32
  }
}

</mosaic_0001>

<bundles_post_ra>
// kernel: tpu_custom_call.1
= control target key start
LH: loop header
LB: loop body
LE: loop exit
PB: predicated region body
PF: predicated region fallthrough
CT: control target
= control target key end

     0   :  { %9 = vsyncpa [#allocation3], 0  ;;  %s971_s0 = inlined_call_operand.hbm [shape: f32[2,4,8,128], index: 0, kind: input, shape index: {}]   ;;  %s972_s1 = inlined_call_operand.hbm [shape: s32[2,8,128], index: 1, kind: input, shape index: {}]   ;;  %s973_s2 = inlined_call_operand.hbm [shape: f32[2,8,128], index: 2, kind: output, shape index: {0}]   ;;  %s974_s3 = inlined_call_operand.hbm [shape: f32[2,8,128], index: 3, kind: output, shape index: {1}]  }
   0x1   :  { %11 = vsyncpa [#allocation3 + $0x1], 0 }
   0x2   :  { %12 = vsyncpa [#allocation6], 0 }
   0x3   :  { %14 = vsyncpa [#allocation6 + $0x1], 0 }
   0x4   :  { %15 = vsyncpa [#allocation4], 0 }
   0x5   :  { %17 = vsyncpa [#allocation4 + $0x1], 0 }
   0x6   :  { %18 = vsyncpa [#allocation9], 0 }
   0x7   :  { %20 = vsyncpa [#allocation9 + $0x1], 0  ;;  %s802_s12 = smov 0   ;;  %s804_s13 = smov 0  }
   0x8   :  { %s806_s14 = smov 0   ;;  %s808_s15 = smov 0  }
   0x9   :  { %s810_s16 = smov 0   ;;  %s812_s17 = smov 0  }
   0xa LB: > { %s490_s18 = sadd.s32 4294967295, %s778_s17   ;;  %s491_s19 = sadd.s32 4294967294, %s778_s17   ;;  %s778_s17 = sphi %s812_s17, %s26_s17   ;;  %s774_s16 = sphi %s810_s16, %s984_s16   ;;  %s770_s15 = sphi %s808_s15, %s983_s15   ;;  %s766_s14 = sphi %s806_s14, %s982_s14   ;;  %s762_s13 = sphi %s804_s13, %s981_s13   ;;  %s758_s12 = sphi %s802_s12, %s980_s12  }
   0xb   : > { %s38_s20 = sadd.s32 1, %s774_s16  ;;  %s47_s21 = sadd.s32 1, %s766_s14 }
   0xc   : > { %p40_p0 = scmp.ge.s32.totalorder %s38_s20, 2  ;;  %p54_p1 = scmp.ne.s32.totalorder %s766_s14, %s762_s13 }
   0xd   : > { %p55_p2 = scmp.eq.s32.totalorder %s778_s17, 0  ;;  %p60_p3 = scmp.ne.s32.totalorder %s762_s13, %s758_s12 }
   0xe   : > { %s986_s20 = smov (%p40_p0, %s38_s20), 0  ;;  %p61_p5 = scmp.eq.s32.totalorder %s490_s18, 0 }
   0xf   : > { %p843_p4 = por %p55_p2, %p54_p1  ;;  %s42_s23 = ssub.s32 %s774_s16, %s986_s20 }
  0x10   : > { %p114_p6 = scmp.eq.s32.totalorder %s490_s18, 1  ;;  %p45_p7 = scmp.eq.s32.totalorder %s42_s23, 0 }
  0x11   : > { %p849_p8 = por %p61_p5, %p60_p3  ;;  %p120_p10 = scmp.eq.s32.totalorder %s491_s19, 1 }
  0x12   : > { %p853_p9 = por %p114_p6, %p54_p1  ;;  %p493_p12 = scmp.ge.s32.totalorder %s778_s17, 2 }
  0x13   : > { %s858_s26 = scalar_select %p45_p7, %s766_s14, %s47_s21  }
  0x14   : > { %p860_p11 = por %p120_p10, %p60_p3  ;;  %p536_p13 = scmp.lt.s32.totalorder %s778_s17, 2 }
  0x15   : > { %s168_s28 = sand.u32 1, %s766_s14   ;;  %s513_s30 = sshll.u32 %s774_s16, 5 }
  0x16   : > { %s494_s29 = sshll.u32 %s168_s28, 5  ;;  %s178_s6 = scalar_lea.hbm %s971_s0, %s513_s30 }
  0x17   : > { %s172_s7 = scalar_lea.vmem [#allocation2], %s494_s29  ;;  %s179_s9 = sshll.u32 %s178_s6, 4  ;;  %s180_s9 = int_to_ptr.hbm [resolvable:$true] %s179_s9 }
  0x18   : > { %s181_s8 = sshll.u32 %s172_s7, 4  ;;  %p873_p0 = pnand %p536_p13, %p843_p4  ;;  %s182_s8 = int_to_ptr.vmem [resolvable:$true] %s181_s8 }
  0x19   : > { %p499_p1 = scmp.ge.s32.totalorder %s778_s17, 1  ;;  %s169_s11 = scalar_lea.sflag [#allocation3], %s168_s28 }
  0x1a   : > { %s780_s18 = smov 128   ;;  %s781_s19 = smov 8  }
  0x1b   : > { %525 = dma.hbm_to_vmem [thread:$0]  (!%p873_p0), %s180_s9, 512, %s182_s8, %s169_s11, %s780_s18, %s780_s18, %s781_s19  }
  0x1c   : > { %p209_p2 = scmp.lt.s32.totalorder %s778_s17, 3  ;;  %s497_s21 = sshll.u32 %s168_s28, 3 }
  0x1d   : > { %s498_s23 = sshll.u32 %s774_s16, 3  ;;  %s195_s4 = scalar_lea.vmem [#allocation5], %s497_s21 }
  0x1e   : > { %p210_p3 = pnand %p499_p1, %p209_p2  ;;  %s200_s22 = scalar_lea.hbm %s972_s1, %s498_s23 }
  0x1f   : > { %s204_s5 = sshll.u32 %s195_s4, 4  ;;  %s202_s6 = sshll.u32 %s200_s22, 4  ;;  %s205_s5 = int_to_ptr.vmem [resolvable:$true] %s204_s5  ;;  %s203_s6 = int_to_ptr.hbm [resolvable:$true] %s202_s6 }
  0x20   : > { %s192_s7 = scalar_lea.sflag [#allocation6], %s168_s28  ;;  %213 = sbr.rel (%p210_p3) target bundleno = 96 (0x60), region = 28 }
  0x21   : > { %528 = dma.hbm_to_vmem [thread:$0]  (!%p873_p0), %s203_s6, 128, %s205_s5, %s192_s7  }
  0x22   : > { %s888_s8 = sand.u32 (!%p210_p3), 1, %s762_s13  }
  0x23   : > { %s500_s9 = sshll.u32 (!%p210_p3), %s888_s8, 5  ;;  %s216_s11 = scalar_lea.sflag (!%p210_p3), [#allocation3], %s888_s8 }
  0x24   : > { %s219_s18 = scalar_lea.vmem (!%p210_p3), [#allocation2], %s500_s9 }
  0x25   : > { %741 = dma.done.wait (%p849_p8), %s216_s11, 512  }
  0x26   : > { %743 = vsyncadd (%p849_p8), %s216_s11, 4294966784  ;;  %s897_s28 = sshll.u32 %s888_s8, 3  ;;  %s226_s10 = scalar_lea.sflag [#allocation6], %s888_s8 }
  0x27   : > { %s229_s19 = scalar_lea.vmem [#allocation5], %s897_s28 }
  0x28   : > { %745 = dma.done.wait (%p849_p8), %s226_s10, 128  }
  0x29   : > { %747 = vsyncadd (%p849_p8), %s226_s10, 4294967168  ;;  %v266_v0 = vld [vmem:[%s219_s18] sm:$0xff]  ;;  %v504_v1 = vld [vmem:[%s219_s18 + $0x8] sm:$0xff]  ;;  %s509_s24 = sshll.u32 %s770_s15, 3  ;;  %s255_s30 = scalar_lea.vmem [#allocation7], %s897_s28 }
  0x2a   : > { %v269_v2 = vmax.f32 %v266_v0, %v504_v1  ;;  %v505_v3 = vld [vmem:[%s219_s18 + $0x10] sm:$0xff]  ;;  %v506_v4 = vld [vmem:[%s219_s18 + $0x18] sm:$0xff]  ;;  %v905_v10 = vld [vmem:[%s229_s19] sm:$0xff]  ;;  %s331_s29 = scalar_lea.hbm %s973_s2, %s509_s24  ;;  %s333_s22 = sshll.u32 %s255_s30, 4  ;;  %s334_s22 = int_to_ptr.vmem [resolvable:$true] %s333_s22 }
  0x2b   : > { %vm264_vm0 = vcmp.ne.s32.totalorder %v905_v10, 255  ;;  %s335_s4 = sshll.u32 %s331_s29, 4  ;;  %s315_s5 = scalar_lea.sflag [#allocation4], %s888_s8  ;;  %s336_s4 = int_to_ptr.hbm [resolvable:$true] %s335_s4 }
  0x2c   : > { %v272_v5 = vmax.f32 %v269_v2, %v505_v3  ;;  %v265_v16 = vsel %vm264_vm0, %v905_v10, 0  ;;  %s674_s6 = sshra.s32 %s336_s4, 4  ;;  %s680_s18 = scalar_lea.hbm %s973_s2, 16  ;;  %s675_s6 = int_to_ptr.hbm [resolvable:$true] %s674_s6 }
  0x2d   : > { %vm280_vm1 = vcmp.eq.s32.totalorder %v265_v16, 0  ;;  %vm287_vm2 = vcmp.eq.s32.totalorder %v265_v16, 1  ;;  %vm294_vm3 = vcmp.eq.s32.totalorder %v265_v16, 2  ;;  %vm301_vm4 = vcmp.eq.s32.totalorder %v265_v16, 3  ;;  %s676_s7 = scalar_lea.hbm %s675_s6, 8  ;;  %p681_p7 = scmp.lt.s32.totalorder %s675_s6, %s973_s2 }
  0x2e   : > { %v275_v6 = vmax.f32 %v272_v5, %v506_v4  ;;  %v281_v22 = vsel %vm280_vm1, %v266_v0, 0.0  ;;  %v288_v23 = vsel %vm287_vm2, %v504_v1, 0.0  ;;  %v295_v27 = vsel %vm294_vm3, %v505_v3, 0.0  ;;  %p677_p4 = scmp.ne.s32.totalorder %s675_s6, %s676_s7  ;;  %p682_p8 = scmp.lt.s32.totalorder %s680_s18, %s676_s7 }
  0x2f   : > { %v289_v26 = vadd.f32 %v288_v23, %v281_v22  ;;  %v302_v29 = vsel %vm301_vm4, %v506_v4, 0.0 }
  0x30   : > { %v276_v7 = vsub.f32 %v266_v0, %v275_v6  ;;  %v283_v8 = vsub.f32 %v504_v1, %v275_v6  ;;  %v290_v9 = vsub.f32 %v505_v3, %v275_v6  ;;  %v297_v11 = vsub.f32 %v506_v4, %v275_v6  ;;  %p678_p5 = pnand %p677_p4, %p853_p9  ;;  %p683_p10 = por %p682_p8, %p681_p7 }
  0x31   : > { %v296_v28 = vadd.f32 %v295_v27, %v289_v26 }
  0x32   : > { %v277_v12 = vmul.f32 1.442695, %v276_v7  ;;  %v284_v13 = vmul.f32 1.442695, %v283_v8  ;;  %v291_v14 = vmul.f32 1.442695, %v290_v9  ;;  %p679_p6 = pneg %p678_p5 }
  0x33   : > { %v298_v15 = vmul.f32 1.442695, %v297_v11  ;;  %v303_v31 = vadd.f32 %v302_v29, %v296_v28 }
  0x34   : > { %588 = vpow2.f32 %v277_v12  ;;  %p684_p13 = pnand %p683_p10, %p679_p6 }
  0x35   : > { %590 = vpow2.f32 %v284_v13 }
  0x36   : > { %592 = vpow2.f32 %v291_v14 }
  0x37   : > { %594 = vpow2.f32 %v298_v15 }
  0x3a   : > { %v589_v17 = vpop.eup %588 }
  0x3b   : > { %v591_v18 = vpop.eup %590 }
  0x3c   : > { %v593_v19 = vpop.eup %592  ;;  %v286_v20 = vadd.f32 %v591_v18, %v589_v17 }
  0x3d   : > { %v595_v21 = vpop.eup %594 }
  0x3e   : > { %v293_v24 = vadd.f32 %v593_v19, %v286_v20 }
  0x40   : > { %v300_v25 = vadd.f32 %v595_v21, %v293_v24 }
  0x42   : > { %596 = vlog2.f32 %v300_v25 }
  0x48   : > { %v597_v30 = vpop.eup %596 }
  0x49   : > { %v305_v32 = vmul.f32 0.6931472, %v597_v30 }
  0x4b   : > { %v306_v33 = vadd.f32 %v305_v32, %v275_v6 }
  0x4d   : > { %v307_v34 = vsub.f32 %v306_v33, %v303_v31 }
  0x4f   : > { %308 = vst [vmem:[%s255_s30] sm:$0xff] %v307_v34  ;;  %v309_v35 = vsub.f32 0.0, %v307_v34 }
  0x50   : > { %687 = shalt.err (!%p684_p13)
}
  0x51   : > { %518 = dma.vmem_to_hbm [thread:$0]  (%p853_p9), %s334_s22, 128, %s336_s4, %s315_s5   ;;  %v310_v36 = vmul.f32 1.442695, %v309_v35 }
  0x52   : > { %s346_s29 = scalar_lea.hbm %s974_s3, %s509_s24  ;;  %s262_s30 = scalar_lea.vmem [#allocation8], %s897_s28 }
  0x53   : > { %598 = vpow2.f32 %v310_v36  ;;  %s348_s6 = sshll.u32 %s262_s30, 4  ;;  %s350_s7 = sshll.u32 %s346_s29, 4  ;;  %s349_s6 = int_to_ptr.vmem [resolvable:$true] %s348_s6  ;;  %s351_s7 = int_to_ptr.hbm [resolvable:$true] %s350_s7 }
  0x54   : > { %s320_s9 = scalar_lea.sflag [#allocation9], %s888_s8  ;;  %s702_s22 = sshra.s32 %s351_s7, 4  ;;  %s703_s22 = int_to_ptr.hbm [resolvable:$true] %s702_s22 }
  0x55   : > { %s704_s4 = scalar_lea.hbm %s703_s22, 8  ;;  %s708_s28 = scalar_lea.hbm %s974_s3, 16 }
  0x56   : > { %p705_p0 = scmp.ne.s32.totalorder %s703_s22, %s704_s4  ;;  %p709_p3 = scmp.lt.s32.totalorder %s703_s22, %s974_s3 }
  0x57   : > { %p710_p4 = scmp.lt.s32.totalorder %s708_s28, %s704_s4 }
  0x58   : > { %p706_p1 = pnand %p705_p0, %p853_p9 }
  0x59   : > { %v599_v37 = vpop.eup %598  ;;  %p711_p5 = por %p710_p4, %p709_p3 }
  0x5a   : > { %v312_v38 = vsel %vm264_vm0, %v599_v37, 1.0  ;;  %p707_p2 = pneg %p706_p1 }
  0x5b   : > { %313 = vst [vmem:[%s262_s30] sm:$0xff] %v312_v38 }
  0x5c   : > { %p712_p6 = pnand %p711_p5, %p707_p2 }
  0x5e   : > { %715 = shalt.err (!%p712_p6)
}
  0x5f   : > { %519 = dma.vmem_to_hbm [thread:$0]  (%p853_p9), %s349_s6, 128, %s351_s7, %s320_s9  }
  0x60 PF: > { %s362_s8 = sand.u32 1, %s758_s12   ;;  %p530_p7 = pnand %p493_p12, %p860_p11 }
  0x61   : > { %s363_s18 = scalar_lea.sflag [#allocation4], %s362_s8 }
  0x62   : > { %p531_p8 = pneg %p530_p7 }
  0x64   : > { %749 = dma.done.wait (%p531_p8), %s363_s18, 128  }
  0x65   : > { %751 = vsyncadd (%p531_p8), %s363_s18, 4294967168  ;;  %s373_s10 = scalar_lea.sflag [#allocation9], %s362_s8 }
  0x66   : > { %753 = dma.done.wait (%p531_p8), %s373_s10, 128  }
  0x67   : > { %755 = vsyncadd (%p531_p8), %s373_s10, 4294967168  ;;  %s26_s17 = sadd.s32 1, %s778_s17   ;;  %s980_s12 = smov %s762_s13 }
  0x68   : > { %p23_p10 = scmp.ge.s32.totalorder %s26_s17, 4   ;;  %s981_s13 = smov %s766_s14 }
  0x69   : > { %s982_s14 = smov %s858_s26  ;;  %s983_s15 = smov %s774_s16 }
  0x6a   : > { %s984_s16 = smov %s986_s20  ;;  %25 = sbr.rel (!%p23_p10) target bundleno = 10 (0xa), region = 106 }
  0x6f   :  { %379 = vsyncpa [#allocation3], 1 }
  0x70   :  { %381 = vsyncpa [#allocation3 + $0x1], 1 }
  0x71   :  { %382 = vsyncpa [#allocation6], 1 }
  0x72   :  { %384 = vsyncpa [#allocation6 + $0x1], 1 }
  0x73   :  { %385 = vsyncpa [#allocation4], 1 }
  0x74   :  { %387 = vsyncpa [#allocation4 + $0x1], 1 }
  0x75   :  { %388 = vsyncpa [#allocation9], 1 }
  0x76   :  { %390 = vsyncpa [#allocation9 + $0x1], 1 }

</bundles_post_ra>
